<compile_context>
chip_gen: v7x
topology: tpu7x:2x2x1
jax: 0.10.0
libtpu: 0.0.40
codegen_flags: <defaults>
</compile_context>

<pallas_src>
import functools

import jax
import jax.numpy as jnp
from jax import lax
from jax.experimental import pallas as pl
from jax.experimental.pallas import tpu as pltpu


def _round_up(x, m):
    return (x + m - 1) // m * m


def _cdiv(a, b):
    return -(-a // b)


def _pow_static(t, gamma):
    """t ** gamma for a static python gamma, t > 0 on valid rows.

    Integer / half-integer gammas become repeated multiplies (+ one sqrt),
    avoiding the log+exp pair on the single EUP; fractional gammas fall back
    to jnp.power."""
    g = float(gamma)
    if g < 0.0 or g > 32.0 or (2.0 * g) != float(int(2.0 * g)):
        return jnp.power(t, g)
    n = int(g)
    has_half = (2.0 * g) != float(2 * n)
    out = None
    base = t
    while n:
        if n & 1:
            out = base if out is None else out * base
        n >>= 1
        if n:
            base = base * base
    if has_half:
        s = jnp.sqrt(t)
        out = s if out is None else out * s
    if out is None:            # gamma == 0
        out = jnp.ones_like(t)
    return out


def _focal_loss_kernel(logits_ref, labels_ref, out_ref, *,
                       alpha, gamma, class_axis, n_valid, tile):
    """One grid step -> one partial sum.

    class_axis == 0: logits tile (C, TL), labels tile (1, TL)  (samples on lanes)
    class_axis == 1: logits tile (TN, C), labels tile (TN, 1)  (classes on lanes)
    """
    x = logits_ref[...].astype(jnp.float32)
    lab = labels_ref[...]                              # int32, size-1 class dim

    cax = class_axis
    sax = 1 - class_axis
    num_classes = x.shape[cax]

    if cax == 1 and num_classes >= 256 and num_classes % 128 == 0:
        # Fold the C/128 lane groups elementwise on the VPU first so every
        # cross-lane reduction is a single 128-lane XLU pass (v7x XLU relief).
        groups = num_classes // 128
        lane = lax.broadcasted_iota(jnp.int32, (1, 128), 1)
        m128 = x[:, 0:128]
        for g in range(1, groups):
            m128 = jnp.maximum(m128, x[:, g * 128:(g + 1) * 128])
        m = jnp.max(m128, axis=1, keepdims=True)                       # (TN,1)
        s128 = jnp.zeros_like(m128)
        e128 = jnp.zeros_like(m128)
        l128 = jnp.zeros_like(m128)
        for g in range(groups):
            xg = x[:, g * 128:(g + 1) * 128]
            s128 = s128 + xg
            e128 = e128 + jnp.exp(xg - m)
            l128 = l128 + jnp.where(lane + g * 128 == lab, xg, 0.0)
        sum_x = jnp.sum(s128, axis=1, keepdims=True)
        x_lab = jnp.sum(l128, axis=1, keepdims=True)
        lse = m + jnp.log(jnp.sum(e128, axis=1, keepdims=True))
    else:
        # numerically-stable log-sum-exp over the class axis
        m = jnp.max(x, axis=cax, keepdims=True)
        lse = m + jnp.log(jnp.sum(jnp.exp(x - m), axis=cax, keepdims=True))
        # class-axis-only iota; the compare broadcasts it against the labels
        iota_shape = (num_classes, 1) if cax == 0 else (1, num_classes)
        cls_iota = lax.broadcasted_iota(jnp.int32, iota_shape, cax)
        x_lab = jnp.sum(jnp.where(cls_iota == lab, x, 0.0),
                        axis=cax, keepdims=True)
        sum_x = jnp.sum(x, axis=cax, keepdims=True)

    lp_lab = x_lab - lse                               # log_softmax at label
    # sum_j log_p[i, j] = sum_j x[i, j] - C * lse_i
    sum_logp = sum_x - jnp.float32(num_classes) * lse
    # focal factor differs from 1 only on the label column
    corr = (_pow_static(1.0 - lp_lab, gamma) - 1.0) * lp_lab
    contrib = sum_logp + corr                          # per-sample row sum

    if n_valid % tile != 0:                            # static: ragged last block
        smp_iota = lax.broadcasted_iota(jnp.int32, contrib.shape, sax)
        gidx = pl.program_id(0) * tile + smp_iota
        contrib = jnp.where(gidx < n_valid, contrib, 0.0)   # select, never mul

    partial = (-alpha) * jnp.sum(contrib)
    out_ref[...] = jnp.full(out_ref.shape, partial, dtype=jnp.float32)


def _choose_tile(n, cap, align):
    """Biggest tile within the VMEM budget, but always >= 2 (even) blocks when
    there is enough work so both v7x TensorCores can be used."""
    nblk = _cdiv(n, cap)
    if nblk == 1 and n >= 2 * align:
        nblk = 2
    if nblk > 1:
        nblk = _round_up(nblk, 2)
    tile = _round_up(_cdiv(n, nblk), align)
    grid = _cdiv(n, tile)
    return tile, grid


def _vmem_limit_bytes():
    try:
        cap = int(pltpu.get_tpu_info().vmem_capacity_bytes)
        return min(64 * 1024 * 1024, cap // 2)     # 64 MiB on v5e/v6e, 32 on v7x
    except Exception:
        return 32 * 1024 * 1024


def focal_loss(logits, labels, *, gamma=2.5, alpha=1.0, size_average=True,
               block_bytes=4 * 1024 * 1024, class_major=False):
    """logits: [N, C] (or [C, N] if class_major=True), labels: [N] int in [0, C)."""
    if class_major:
        C, N = logits.shape
    else:
        N, C = logits.shape
    labels = labels.astype(jnp.int32)
    itemsize = jnp.dtype(logits.dtype).itemsize

    if C < 128 or class_major:
        # Small class count: samples on the lane axis -> lane-dense vregs.
        x = logits if class_major else jnp.transpose(logits)       # (C, N)
        align = 128
        cap = max(align,
                  min((block_bytes // (C * itemsize)) // align * align, 1 << 17))
        tile, grid = _choose_tile(N, cap, align)
        labels2d = labels.reshape(1, N)
        in_specs = [
            pl.BlockSpec((C, tile), lambda i: (0, i)),
            pl.BlockSpec((1, tile), lambda i: (0, i)),
        ]
        class_axis = 0
    else:
        # Large class count: classes already lane-dense; tile over rows.
        x = logits                                                  # (N, C)
        align = 8
        cap = max(align,
                  min((block_bytes // (C * itemsize)) // align * align, 1 << 14))
        tile, grid = _choose_tile(N, cap, align)
        labels2d = labels.reshape(N, 1)
        in_specs = [
            pl.BlockSpec((tile, C), lambda i: (i, 0)),
            pl.BlockSpec((tile, 1), lambda i: (i, 0)),
        ]
        class_axis = 1

    kernel = functools.partial(
        _focal_loss_kernel, alpha=float(alpha), gamma=float(gamma),
        class_axis=class_axis, n_valid=N, tile=tile)

    partials = pl.pallas_call(
        kernel,
        out_shape=jax.ShapeDtypeStruct((grid, 8, 128), jnp.float32),
        grid_spec=pltpu.PrefetchScalarGridSpec(
            num_scalar_prefetch=0,
            grid=(grid,),
            in_specs=in_specs,
            out_specs=pl.BlockSpec((1, 8, 128), lambda i: (i, 0, 0)),
        ),
        compiler_params=pltpu.CompilerParams(
            dimension_semantics=("parallel",),
            vmem_limit_bytes=_vmem_limit_bytes(),
        ),
    )(x, labels2d)

    total = jnp.sum(partials[:, 0, 0])
    if size_average:
        return total / jnp.float32(N * C)
    return total


def _focal_loss_ref(logits, labels, *, gamma=2.5, alpha=1.0, size_average=True):
    log_p = jax.nn.log_softmax(logits.astype(jnp.float32), axis=-1)
    onehot = jax.nn.one_hot(labels, logits.shape[-1], dtype=jnp.float32)
    pt = onehot * log_p
    fl = -alpha * jnp.power(1.0 - pt, gamma) * log_p
    return fl.mean() if size_average else fl.sum()


if __name__ == "__main__":
    key = jax.random.PRNGKey(0)
    k1, k2, k3, k4, k5, k6 = jax.random.split(key, 6)

    # Case 1: small class count, ragged N (grid partial block + in-kernel mask).
    N1, C1 = 100, 7
    logits1 = jax.random.normal(k1, (N1, C1), dtype=jnp.float32)
    labels1 = jax.random.randint(k2, (N1,), 0, C1, dtype=jnp.int32)
    out1 = jax.block_until_ready(
        focal_loss(logits1, labels1, gamma=2.5, alpha=1.0, size_average=True))
    ref1 = _focal_loss_ref(logits1, labels1, gamma=2.5, alpha=1.0, size_average=True)
    assert jnp.allclose(out1, ref1, rtol=1e-4, atol=1e-5), (out1, ref1)

    # Case 1b: class-major fast path (caller provides [C, N]; no wrapper transpose).
    out1b = jax.block_until_ready(
        focal_loss(jnp.transpose(logits1), labels1, gamma=2.5, alpha=1.0,
                   size_average=True, class_major=True))
    assert jnp.allclose(out1b, ref1, rtol=1e-4, atol=1e-5), (out1b, ref1)

    # Case 2: C == 128 (row-tiled direct path), ragged N, sum reduction, grid=2.
    N2, C2 = 50, 128
    logits2 = jax.random.normal(k3, (N2, C2), dtype=jnp.float32)
    labels2 = jax.random.randint(k4, (N2,), 0, C2, dtype=jnp.int32)
    out2 = jax.block_until_ready(
        focal_loss(logits2, labels2, gamma=2.5, alpha=1.0, size_average=False))
    ref2 = _focal_loss_ref(logits2, labels2, gamma=2.5, alpha=1.0, size_average=False)
    assert jnp.allclose(out2, ref2, rtol=1e-4, atol=1e-4), (out2, ref2)

    # Case 3: C = 256 -> lane-group-folded reduction path, integer gamma.
    N3, C3 = 64, 256
    logits3 = jax.random.normal(k5, (N3, C3), dtype=jnp.float32)
    labels3 = jax.random.randint(k6, (N3,), 0, C3, dtype=jnp.int32)
    out3 = jax.block_until_ready(
        focal_loss(logits3, labels3, gamma=2.0, alpha=0.5, size_average=True))
    ref3 = _focal_loss_ref(logits3, labels3, gamma=2.0, alpha=0.5, size_average=True)
    assert jnp.allclose(out3, ref3, rtol=1e-4, atol=1e-5), (out3, ref3)

    print("KERNEL_OK")
</pallas_src>

<mosaic_0001>
module attributes {stable_mosaic.version = 11 : i64} {
  func.func @_focal_loss_kernel(%arg0: i32, %arg1: memref<7x128xf32, #tpu.memory_space<vmem>>, %arg2: memref<1x128xi32, #tpu.memory_space<vmem>>, %arg3: memref<1x8x128xf32, #tpu.memory_space<vmem>>) attributes {dimension_semantics = [#tpu.dimension_semantics<parallel>], iteration_bounds = array<i64: 1>, scalar_prefetch = 0 : i64, scratch_operands = 0 : i64, tpu.core_type = #tpu.core_type<tc>, window_params = [{transform_indices = @transform_0, window_bounds = array<i64: 7, 128>}, {transform_indices = @transform_1, window_bounds = array<i64: 1, 128>}, {transform_indices = @transform_2, window_bounds = array<i64: 1, 8, 128>}]} {
    %c0 = arith.constant 0 : index
    %c0_0 = arith.constant 0 : index
    %0 = vector.load %arg1[%c0, %c0_0] : memref<7x128xf32, #tpu.memory_space<vmem>>, vector<7x128xf32>
    %c0_1 = arith.constant 0 : index
    %c0_2 = arith.constant 0 : index
    %1 = vector.load %arg2[%c0_1, %c0_2] : memref<1x128xi32, #tpu.memory_space<vmem>>, vector<1x128xi32>
    %cst = arith.constant dense<0xFF800000> : vector<128xf32>
    %2 = vector.multi_reduction <maximumf>, %0, %cst [0] : vector<7x128xf32> to vector<128xf32>
    %3 = vector.shape_cast %2 : vector<128xf32> to vector<1x128xf32>
    %4 = vector.broadcast %3 : vector<1x128xf32> to vector<7x128xf32>
    %5 = arith.subf %0, %4 : vector<7x128xf32>
    %6 = math.exp %5 : vector<7x128xf32>
    %cst_3 = arith.constant dense<0.000000e+00> : vector<128xf32>
    %7 = vector.multi_reduction <add>, %6, %cst_3 [0] : vector<7x128xf32> to vector<128xf32>
    %8 = vector.shape_cast %7 : vector<128xf32> to vector<1x128xf32>
    %9 = math.log %8 : vector<1x128xf32>
    %10 = arith.addf %3, %9 : vector<1x128xf32>
    %11 = tpu.iota {dimensions = array<i32: 0>} : vector<7x1xi32>
    %12 = vector.broadcast %11 : vector<7x1xi32> to vector<7x128xi32>
    %13 = vector.broadcast %1 : vector<1x128xi32> to vector<7x128xi32>
    %14 = arith.cmpi eq, %12, %13 : vector<7x128xi32>
    %cst_4 = arith.constant 0.000000e+00 : f32
    %15 = vector.broadcast %cst_4 : f32 to vector<7x128xf32>
    %16 = arith.select %14, %0, %15 : vector<7x128xi1>, vector<7x128xf32>
    %cst_5 = arith.constant dense<0.000000e+00> : vector<128xf32>
    %17 = vector.multi_reduction <add>, %16, %cst_5 [0] : vector<7x128xf32> to vector<128xf32>
    %18 = vector.shape_cast %17 : vector<128xf32> to vector<1x128xf32>
    %cst_6 = arith.constant dense<0.000000e+00> : vector<128xf32>
    %19 = vector.multi_reduction <add>, %0, %cst_6 [0] : vector<7x128xf32> to vector<128xf32>
    %20 = vector.shape_cast %19 : vector<128xf32> to vector<1x128xf32>
    %21 = arith.subf %18, %10 : vector<1x128xf32>
    %cst_7 = arith.constant 7.000000e+00 : f32
    %22 = vector.broadcast %cst_7 : f32 to vector<1x128xf32>
    %23 = arith.mulf %22, %10 : vector<1x128xf32>
    %24 = arith.subf %20, %23 : vector<1x128xf32>
    %cst_8 = arith.constant 1.000000e+00 : f32
    %25 = vector.broadcast %cst_8 : f32 to vector<1x128xf32>
    %26 = arith.subf %25, %21 : vector<1x128xf32>
    %27 = arith.mulf %26, %26 : vector<1x128xf32>
    %28 = math.sqrt %26 : vector<1x128xf32>
    %29 = arith.mulf %27, %28 : vector<1x128xf32>
    %cst_9 = arith.constant 1.000000e+00 : f32
    %30 = vector.broadcast %cst_9 : f32 to vector<1x128xf32>
    %31 = arith.subf %29, %30 : vector<1x128xf32>
    %32 = arith.mulf %31, %21 : vector<1x128xf32>
    %33 = arith.addf %24, %32 : vector<1x128xf32>
    %34 = tpu.iota {dimensions = array<i32: 1>} : vector<1x128xi32>
    %c128_i32 = arith.constant 128 : i32
    %35 = arith.muli %arg0, %c128_i32 : i32
    %36 = vector.broadcast %35 : i32 to vector<1x128xi32>
    %37 = arith.addi %36, %34 : vector<1x128xi32>
    %c100_i32 = arith.constant 100 : i32
    %38 = vector.broadcast %c100_i32 : i32 to vector<1x128xi32>
    %39 = arith.cmpi slt, %37, %38 : vector<1x128xi32>
    %cst_10 = arith.constant 0.000000e+00 : f32
    %40 = vector.broadcast %cst_10 : f32 to vector<1x128xf32>
    %41 = arith.select %39, %33, %40 : vector<1x128xi1>, vector<1x128xf32>
    %42 = vector.shape_cast %41 : vector<1x128xf32> to vector<1x1x128xf32>
    %cst_11 = arith.constant dense<0.000000e+00> : vector<1xf32>
    %43 = vector.multi_reduction <add>, %42, %cst_11 [1, 2] : vector<1x1x128xf32> to vector<1xf32>
    %44 = vector.shape_cast %43 : vector<1xf32> to vector<1x1x1xf32>
    %45 = vector.extract %44[0, 0, 0] : f32 from vector<1x1x1xf32>
    %cst_12 = arith.constant -1.000000e+00 : f32
    %46 = arith.mulf %cst_12, %45 : f32
    %47 = vector.broadcast %46 : f32 to vector<1x8x128xf32>
    %c0_13 = arith.constant 0 : index
    %c0_14 = arith.constant 0 : index
    %c0_15 = arith.constant 0 : index
    %48 = vector.load %arg3[%c0_13, %c0_14, %c0_15] : memref<1x8x128xf32, #tpu.memory_space<vmem>>, vector<1x8x128xf32>
    tpu.vector_store %arg3[%c0_13, %c0_14, %c0_15], %47 {strides = array<i32>} : memref<1x8x128xf32, #tpu.memory_space<vmem>>, vector<1x8x128xf32>,
    return
  }
  func.func @transform_0(%arg0: i32) -> (i32, i32) {
    %c0_i32 = arith.constant 0 : i32
    %c0_i32_0 = arith.constant 0 : i32
    return %c0_i32, %arg0 : i32, i32
  }
  func.func @transform_1(%arg0: i32) -> (i32, i32) {
    %c0_i32 = arith.constant 0 : i32
    %c0_i32_0 = arith.constant 0 : i32
    return %c0_i32, %arg0 : i32, i32
  }
  func.func @transform_2(%arg0: i32) -> (i32, i32, i32) {
    %c0_i32 = arith.constant 0 : i32
    %c0_i32_0 = arith.constant 0 : i32
    %c0_i32_1 = arith.constant 0 : i32
    return %arg0, %c0_i32, %c0_i32_0 : i32, i32, i32
  }
}

</mosaic_0001>

<bundles_post_ra>
// kernel: tpu_custom_call.1
= control target key start
LH: loop header
LB: loop body
LE: loop exit
PB: predicated region body
PF: predicated region fallthrough
CT: control target
= control target key end

     0   :  { %7 = vsyncpa [#allocation3], 0  ;;  %s229_s0 = inlined_call_operand.hbm [shape: f32[7,100], index: 0, kind: input, shape index: {}]   ;;  %s230_s1 = inlined_call_operand.vmem [shape: s32[1,100], index: 1, kind: input, shape index: {}]   ;;  %s231_s2 = inlined_call_operand.hbm [shape: f32[1,8,128], index: 2, kind: output, shape index: {}]  }
   0x1   :  { %8 = vsyncpa [#allocation4], 0  ;;  %s181_s9 = smov [#allocation2]   ;;  %s133_s13 = scalar_lea.hbm %s229_s0, 128 }
   0x2   :  { %s15_s10 = sshll.u32 %s181_s9, 4  ;;  %p134_p0 = scmp.ne.s32.totalorder %s229_s0, %s133_s13  ;;  %s16_s10 = int_to_ptr.vmem [resolvable:$true] %s15_s10 }
   0x3   :  { %p137_p1 = scmp.lt.u32.totalorder %s133_s13, %s229_s0 }
   0x5   :  { %p139_p2 = pnand %p137_p1, %p134_p0 }
   0x7   :  { %142 = shalt.err (!%p139_p2)
}
   0x8   :  { %s143_s18 = scalar_lea.vmem %s16_s10, 128  ;;  %p148_p4 = scmp.lt.s32.totalorder %s16_s10, %s16_s10 }
   0x9   :  { %p144_p3 = scmp.ne.s32.totalorder %s16_s10, %s143_s18  ;;  %p149_p5 = scmp.lt.s32.totalorder %s143_s18, %s143_s18 }
   0xb   :  { %p150_p6 = por %p149_p5, %p148_p4 }
   0xd   :  { %p151_p7 = pnand %p150_p6, %p144_p3 }
   0xf   :  { %154 = shalt.err (!%p151_p7)
}
  0x10   :  { %18 = dma.hbm_to_vmem [thread:$0]  %s229_s0, 128, %s16_s10, [#allocation3]  }
  0x11   :  { %177 = dma.done.wait [#allocation3], 128  }
  0x12   :  { %178 = vsyncadd [#allocation3], 4294967168  ;;  %vm26_vm0 = vcmask 1046528   ;;  %v24_v0 = vld [vmem:[#allocation2] sm:$0x7f]  ;;  %v47_v11 = vlaneseq  ;;  %vm92_vm5 = vcmask 1040384  }
  0x13   :  { %v27_v1 = vsel %vm26_vm0, %v24_v0, -inf  ;;  %v62_v2 = vsel %vm26_vm0, %v24_v0, 0.0  ;;  %v121_v13 = vld [vmem:[%s230_s1] ss:$0 sm:$0xff]  ;;  %s182_s1 = smov [#allocation5]  }
  0x14   :  { %v28_v3 = vrot.slane %v27_v1, 4  ;;  %v48_v12 = vshrl.u32 %v47_v11, 7  ;;  %v63_v32 = vrot.slane %v62_v2, 4  ;;  %v86_v49 = vand.u32 127, %v47_v11  ;;  %s112_s22 = sshll.u32 %s182_s1, 4  ;;  %s113_s22 = int_to_ptr.vmem [resolvable:$true] %s112_s22 }
  0x15   :  { %s155_s25 = scalar_lea.vmem %s113_s22, 128  ;;  %p160_p9 = scmp.lt.s32.totalorder %s113_s22, %s113_s22 }
  0x16   :  { %v29_v4 = vmax.f32 %v27_v1, %v28_v3  ;;  %vm53_vm1 = vcmp.eq.s32.totalorder %v48_v12, %v121_v13  ;;  %v64_v35 = vadd.f32 %v63_v32, %v62_v2  ;;  %vm90_vm4 = vcmp.lt.s32.totalorder %v86_v49, 100  ;;  %p156_p8 = scmp.ne.s32.totalorder %s113_s22, %s155_s25  ;;  %p161_p10 = scmp.lt.s32.totalorder %s155_s25, %s155_s25 }
  0x17   :  { %v54_v14 = vsel %vm53_vm1, %v24_v0, 0.0 }
  0x18   :  { %v30_v5 = vrot.slane %v29_v4, 2  ;;  %v55_v18 = vsel %vm26_vm0, %v54_v14, 0.0  ;;  %v65_v37 = vrot.slane %v64_v35, 2  ;;  %p162_p11 = por %p161_p10, %p160_p9 }
  0x19   :  { %v56_v20 = vrot.slane %v55_v18, 4 }
  0x1a   :  { %v31_v6 = vmax.f32 %v29_v4, %v30_v5  ;;  %v66_v38 = vadd.f32 %v65_v37, %v64_v35  ;;  %p163_p12 = pnand %p162_p11, %p156_p8 }
  0x1b   :  { %v57_v23 = vadd.f32 %v56_v20, %v55_v18 }
  0x1c   :  { %v32_v7 = vrot.slane %v31_v6, 1  ;;  %v67_v39 = vrot.slane %v66_v38, 1 }
  0x1d   :  { %v58_v26 = vrot.slane %v57_v23, 2 }
  0x1e   :  { %v33_v8 = vmax.f32 %v31_v6, %v32_v7  ;;  %v68_v44 = vadd.f32 %v67_v39, %v66_v38 }
  0x1f   :  { %v59_v27 = vadd.f32 %v58_v26, %v57_v23 }
  0x20   :  { %v34_v9 = vsub.f32 %v24_v0, %v33_v8 }
  0x21   :  { %v60_v28 = vrot.slane %v59_v27, 1 }
  0x22   :  { %v35_v10 = vmul.f32 1.442695, %v34_v9 }
  0x23   :  { %v61_v31 = vadd.f32 %v60_v28, %v59_v27 }
  0x24   :  { %127 = vpow2.f32 %v35_v10 }
  0x2e   :  { %v128_v15 = vpop.eup %127 }
  0x2f   :  { %v37_v16 = vsel %vm26_vm0, %v128_v15, 0.0 }
  0x30   :  { %v38_v17 = vrot.slane %v37_v16, 4 }
  0x32   :  { %v39_v19 = vadd.f32 %v38_v17, %v37_v16 }
  0x34   :  { %v40_v21 = vrot.slane %v39_v19, 2 }
  0x36   :  { %v41_v22 = vadd.f32 %v40_v21, %v39_v19 }
  0x38   :  { %v42_v24 = vrot.slane %v41_v22, 1 }
  0x3a   :  { %v43_v25 = vadd.f32 %v42_v24, %v41_v22 }
  0x3c   :  { %129 = vlog2.f32 %v43_v25 }
  0x46   :  { %v130_v29 = vpop.eup %129 }
  0x47   :  { %v45_v30 = vmul.f32 0.6931472, %v130_v29 }
  0x49   :  { %v46_v33 = vadd.f32 %v45_v30, %v33_v8 }
  0x4b   :  { %v69_v34 = vsub.f32 %v61_v31, %v46_v33  ;;  %v70_v45 = vmul.f32 7.0, %v46_v33 }
  0x4d   :  { %v72_v36 = vsub.f32 1.0, %v69_v34  ;;  %v71_v50 = vsub.f32 %v68_v44, %v70_v45 }
  0x4f   :  { %131 = vrsqrt.f32 %v72_v36  ;;  %vm76_vm2 = vcmp.eq.f32.partialorder %v72_v36, inf  ;;  %v79_v41 = vand.u32 2147483648, %v72_v36  ;;  %v73_v42 = vmul.f32 %v72_v36, %v72_v36 }
  0x50   :  { %vm78_vm3 = vcmp.eq.f32.partialorder %v72_v36, 0.0 }
  0x59   :  { %v132_v40 = vpop.eup %131 }
  0x5a   :  { %v75_v43 = vmul.f32 %v132_v40, %v72_v36 }
  0x5c   :  { %v77_v46 = vsel %vm76_vm2, %v72_v36, %v75_v43 }
  0x5d   :  { %v80_v47 = vsel %vm78_vm3, %v79_v41, %v77_v46 }
  0x5e   :  { %v81_v48 = vmul.f32 %v80_v47, %v73_v42 }
  0x60   :  { %v122_v51 = vadd.f32 -1.0, %v81_v48 }
  0x62   :  { %v83_v52 = vmul.f32 %v122_v51, %v69_v34 }
  0x64   :  { %v84_v53 = vadd.f32 %v83_v52, %v71_v50 }
  0x66   :  { %v91_v54 = vsel %vm90_vm4, %v84_v53, 0.0 }
  0x67   :  { %v93_v55 = vsel %vm92_vm5, %v91_v54, 0.0 }
  0x68   :  { %94 = vadd.xlane.f32.xlu0 %v93_v55 }
  0xf5   :  { %v95_v56 = vpop.xlane.xlu0 %94 }
  0xf6   :  { %v96_v57 = vrot.slane %v95_v56, 4 }
  0xf8   :  { %v97_v58 = vadd.f32 %v96_v57, %v95_v56 }
  0xfa   :  { %v98_v59 = vrot.slane %v97_v58, 2 }
  0xfc   :  { %v99_v60 = vadd.f32 %v98_v59, %v97_v58 }
  0xfe   :  { %v100_v61 = vrot.slane %v99_v60, 1 }
 0x100   :  { %v101_v62 = vadd.f32 %v100_v61, %v99_v60 }
 0x102   :  { %123 = vpush %v101_v62 }
 0x133   :  { %s124_s23 = spop %123 }
 0x134   :  { %s103_s24 = smul.f32 -1.0, %s124_s23 }
 0x136   :  { %v104_v63 = vstv %s103_s24 }
 0x137   :  { %105 = vst [vmem:[#allocation5] sm:$0xff] %v104_v63 }
 0x138   :  { %166 = shalt.err (!%p163_p12)
}
 0x139   :  { %s167_s28 = scalar_lea.hbm %s231_s2, 128 }
 0x13a   :  { %p168_p13 = scmp.ne.s32.totalorder %s231_s2, %s167_s28  ;;  %p171_p0 = scmp.lt.u32.totalorder %s167_s28, %s231_s2 }
 0x13c   :  { %p173_p1 = pnand %p171_p0, %p168_p13 }
 0x13e   :  { %176 = shalt.err (!%p173_p1)
}
 0x13f   :  { %115 = dma.vmem_to_hbm [thread:$0]  %s113_s22, 128, %s231_s2, [#allocation4]  }
 0x140   :  { %179 = dma.done.wait [#allocation4], 128  }
 0x141   :  { %180 = vsyncadd [#allocation4], 4294967168 }
 0x142   :  { %119 = vsyncpa [#allocation3], 1 }
 0x143   :  { %120 = vsyncpa [#allocation4], 1 }

</bundles_post_ra>
